<compile_context>
chip_gen: v7x
topology: tpu7x:2x2x1
jax: 0.10.0
libtpu: 0.0.40
codegen_flags: <defaults>
</compile_context>

<pallas_src>
import jax
import jax.numpy as jnp
from jax.experimental import pallas as pl
from jax.experimental.pallas import tpu as pltpu


def linreg_kernel(x_ref, w_ref, o_ref):
    # Outer product on the VPU: (TB, 1) * (1, TT) broadcast-multiply -> (TB, TT).
    o_ref[...] = x_ref[...] * w_ref[...]


def linear_regression_forward(x, weight):
    """x: (B, 1) float32, weight: (T, 1) float32 -> (B, T) float32."""
    B = x.shape[0]
    T = weight.shape[0]

    # Layout plumbing in the wrapper (free relative to the kernel):
    #  - weight presented as a lane-dense (1, Tp) row, Tp a multiple of 128
    #  - x padded to Bp (multiple of 8 sublanes)
    Bp = ((B + 7) // 8) * 8
    Tp = ((T + 127) // 128) * 128

    w_row = weight.reshape(1, T).astype(jnp.float32)
    if Tp != T:
        w_row = jnp.pad(w_row, ((0, 0), (0, Tp - T)))
    x_col = x.astype(jnp.float32)
    if Bp != B:
        x_col = jnp.pad(x_col, ((0, Bp - B), (0, 0)))

    # Tile sizes: whole array at small shapes, bounded tiles at large shapes so
    # double-buffered VMEM stays well under the scoped limit (v7x has 64 MiB).
    TB = min(Bp, 512)    # sublane-dim tile (multiple of 8)
    TT = min(Tp, 2048)   # lane-dim tile (multiple of 128)
    grid = (Bp // TB, Tp // TT)

    out_padded = pl.pallas_call(
        linreg_kernel,
        out_shape=jax.ShapeDtypeStruct((Bp, Tp), jnp.float32),
        grid=grid,
        in_specs=[
            pl.BlockSpec((TB, 1), lambda i, j: (i, 0)),   # x rows for tile i
            pl.BlockSpec((1, TT), lambda i, j: (0, j)),   # lane-dense weight cols for tile j
        ],
        out_specs=pl.BlockSpec((TB, TT), lambda i, j: (i, j)),  # unmasked full-lane stores
        compiler_params=pltpu.CompilerParams(
            dimension_semantics=("parallel", "parallel"),
        ),
    )(x_col, w_row)

    # Slice the padding back off in the wrapper.
    return out_padded[:B, :T]


if __name__ == "__main__":
    n_timesteps = 32
    batch = 8

    # Deterministic parameter init matching torch.nn.init.ones_(self.linear.weight)
    weight = jnp.ones((n_timesteps, 1), dtype=jnp.float32)

    key = jax.random.PRNGKey(0)
    x = jax.random.normal(key, (batch, 1), dtype=jnp.float32)

    y = linear_regression_forward(x, weight)
    y = jax.block_until_ready(y)

    # Reference check (pure JAX): y = x @ weight.T
    y_ref = x @ weight.T
    assert y.shape == (batch, n_timesteps)
    assert jnp.allclose(y, y_ref, atol=1e-6), "mismatch vs reference"

    print("KERNEL_OK")
</pallas_src>

<mosaic_0001>
module attributes {stable_mosaic.version = 11 : i64} {
  func.func @linreg_kernel(%arg0: i32, %arg1: i32, %arg2: memref<8x1xf32, #tpu.memory_space<vmem>>, %arg3: memref<1x128xf32, #tpu.memory_space<vmem>>, %arg4: memref<8x128xf32, #tpu.memory_space<vmem>>) attributes {dimension_semantics = [#tpu.dimension_semantics<parallel>, #tpu.dimension_semantics<parallel>], iteration_bounds = array<i64: 1, 1>, scalar_prefetch = 0 : i64, scratch_operands = 0 : i64, tpu.core_type = #tpu.core_type<tc>, window_params = [{transform_indices = @transform_0, window_bounds = array<i64: 8, 1>}, {transform_indices = @transform_1, window_bounds = array<i64: 1, 128>}, {transform_indices = @transform_2, window_bounds = array<i64: 8, 128>}]} {
    %c0 = arith.constant 0 : index
    %c0_0 = arith.constant 0 : index
    %0 = vector.load %arg2[%c0, %c0_0] : memref<8x1xf32, #tpu.memory_space<vmem>>, vector<8x1xf32>
    %c0_1 = arith.constant 0 : index
    %c0_2 = arith.constant 0 : index
    %1 = vector.load %arg3[%c0_1, %c0_2] : memref<1x128xf32, #tpu.memory_space<vmem>>, vector<1x128xf32>
    %2 = vector.broadcast %0 : vector<8x1xf32> to vector<8x128xf32>
    %3 = vector.broadcast %1 : vector<1x128xf32> to vector<8x128xf32>
    %4 = arith.mulf %2, %3 : vector<8x128xf32>
    %c0_3 = arith.constant 0 : index
    %c0_4 = arith.constant 0 : index
    %5 = vector.load %arg4[%c0_3, %c0_4] : memref<8x128xf32, #tpu.memory_space<vmem>>, vector<8x128xf32>
    tpu.vector_store %arg4[%c0_3, %c0_4], %4 {strides = array<i32>} : memref<8x128xf32, #tpu.memory_space<vmem>>, vector<8x128xf32>,
    return
  }
  func.func @transform_0(%arg0: i32, %arg1: i32) -> (i32, i32) {
    %c0_i32 = arith.constant 0 : i32
    %c0_i32_0 = arith.constant 0 : i32
    return %arg0, %c0_i32 : i32, i32
  }
  func.func @transform_1(%arg0: i32, %arg1: i32) -> (i32, i32) {
    %c0_i32 = arith.constant 0 : i32
    %c0_i32_0 = arith.constant 0 : i32
    return %c0_i32, %arg1 : i32, i32
  }
  func.func @transform_2(%arg0: i32, %arg1: i32) -> (i32, i32) {
    %c0_i32 = arith.constant 0 : i32
    return %arg0, %arg1 : i32, i32
  }
}

</mosaic_0001>

<bundles_post_ra>
// kernel: tpu_custom_call.1
= control target key start
LH: loop header
LB: loop body
LE: loop exit
PB: predicated region body
PF: predicated region fallthrough
CT: control target
= control target key end

     0   :  { %s104_s0 = inlined_call_operand.vmem [shape: f32[8,1], index: 0, kind: input, shape index: {}]   ;;  %s105_s1 = inlined_call_operand.vmem [shape: f32[1,128], index: 1, kind: input, shape index: {}]   ;;  %s106_s2 = inlined_call_operand.hbm [shape: f32[8,128], index: 2, kind: output, shape index: {}]  }
   0x1   :  { %v12_v0 = vld [vmem:[%s104_s0] sm:$0xff] }
   0x2   :  { %7 = vsyncpa [#allocation3], 0  ;;  %v69_v1 = vmov 0   ;;  %v41_v2 = vld [vmem:[%s105_s1] ss:$0 sm:$0xff]  ;;  %s70_s13 = smov [#allocation2]  }
   0x3   :  { %44 = vset.pattern.permute.xlu0 %v69_v1  ;;  %s33_s14 = sshll.u32 %s70_s13, 4  ;;  %s34_s14 = int_to_ptr.vmem [resolvable:$true] %s33_s14 }
   0x4   :  { %16 = vperm.xlu0 %44, %v12_v0   ;;  %s45_s15 = scalar_lea.vmem %s34_s14, 128  ;;  %p50_p1 = scmp.lt.s32.totalorder %s34_s14, %s34_s14 }
   0x5   :  { %p46_p0 = scmp.ne.s32.totalorder %s34_s14, %s45_s15  ;;  %p51_p2 = scmp.lt.s32.totalorder %s45_s15, %s45_s15 }
   0x7   :  { %p52_p3 = por %p51_p2, %p50_p1 }
   0x9   :  { %p53_p4 = pnand %p52_p3, %p46_p0 }
  0x83   :  { %v17_v3 = vpop.permute.xlu0 %16 }
  0x84   :  { %v25_v4 = vmul.f32 %v41_v2, %v17_v3 }
  0x86   :  { %26 = vst [vmem:[#allocation2] sm:$0xff] %v25_v4 }
  0x87   :  { %56 = shalt.err (!%p53_p4)
}
  0x88   :  { %s57_s17 = scalar_lea.hbm %s106_s2, 128 }
  0x89   :  { %p58_p5 = scmp.ne.s32.totalorder %s106_s2, %s57_s17  ;;  %p61_p6 = scmp.lt.u32.totalorder %s57_s17, %s106_s2 }
  0x8b   :  { %p63_p7 = pnand %p61_p6, %p58_p5 }
  0x8d   :  { %66 = shalt.err (!%p63_p7)
}
  0x8e   :  { %36 = dma.vmem_to_hbm [thread:$0]  %s34_s14, 128, %s106_s2, [#allocation3]  }
  0x8f   :  { %67 = dma.done.wait [#allocation3], 128  }
  0x90   :  { %68 = vsyncadd [#allocation3], 4294967168 }
  0x91   :  { %40 = vsyncpa [#allocation3], 1 }

</bundles_post_ra>
